<compile_context>
chip_gen: v7x
topology: tpu7x:2x2x1
jax: 0.10.0
libtpu: 0.0.40
codegen_flags: <defaults>
</compile_context>

<pallas_src>
import functools

import jax
import jax.numpy as jnp
import numpy as np
from jax.experimental import pallas as pl
from jax.experimental.pallas import tpu as pltpu

_BN_EPS = 1e-5
_VMEM_LIMIT = 32 * 1024 * 1024   # explicit scoped-VMEM limit (> v5e's 16 MiB default)


def _compiler_params():
    return pltpu.CompilerParams(
        dimension_semantics=("parallel",),
        vmem_limit_bytes=_VMEM_LIMIT,
    )


def _conv_stats_kernel(*refs, apply_bn_relu):
    """Conv1d(k=3, pad=1, bias=False) over the visit axis for one case tile.

    Optionally applies the previous layer's (training-mode) BatchNorm affine
    (already folded into scale/shift outside the kernel) + ReLU first. Emits
    the raw conv output and per-tile (sum, sum-of-squares) channel statistics
    so exact full-batch BN statistics can be assembled outside.
    """
    if apply_bn_relu:
        x_ref, scale_ref, shift_ref, w_ref, raw_ref, stats_ref = refs
    else:
        x_ref, w_ref, raw_ref, stats_ref = refs

    tn, v, cin = x_ref.shape
    cout = raw_ref.shape[-1]

    x = x_ref[...]
    if apply_bn_relu:
        x = jnp.maximum(x * scale_ref[...] + shift_ref[...], 0.0)

    # shift-and-accumulate conv: out[t] = x[t-1] @ W0 + x[t] @ W1 + x[t+1] @ W2
    z = jnp.zeros_like(x[:, :1, :])
    x_prev = jnp.concatenate([z, x[:, :-1, :]], axis=1)    # x[t-1]
    x_next = jnp.concatenate([x[:, 1:, :], z], axis=1)     # x[t+1]

    def tap(a, k):
        a2 = a.reshape(tn * v, cin)
        w = w_ref[k]                                        # (Cin, Cout)
        if cin == 1:
            # degenerate contraction -> plain broadcast multiply on the VPU
            return a2 * w
        return jnp.dot(a2, w, preferred_element_type=jnp.float32)

    raw = tap(x_prev, 0) + tap(x, 1) + tap(x_next, 2)       # (TN*V, Cout) f32
    raw_ref[...] = raw.reshape(tn, v, cout)

    s = jnp.sum(raw, axis=0, keepdims=True)                 # (1, Cout)
    ss = jnp.sum(raw * raw, axis=0, keepdims=True)          # (1, Cout)
    stats_ref[...] = jnp.concatenate([s, ss], axis=0).reshape(1, 2, cout)


def _attention_kernel(raw_ref, scale_ref, shift_ref, m_ref, lwow_ref, ob_ref, y_ref):
    """BN2 + ReLU + vectorized label attention + sigmoid head for one case tile."""
    tn, v, c = raw_ref.shape
    n_label = y_ref.shape[-1]

    h = jnp.maximum(raw_ref[...] * scale_ref[...] + shift_ref[...], 0.0)  # (TN,V,C)

    # One matmul for all labels plus the folded output projection:
    # columns [0, L) are the attention logits, column L is s = h . out_w.
    proj = jnp.dot(h.reshape(tn * v, c), lwow_ref[...],
                   preferred_element_type=jnp.float32).reshape(tn, v, n_label + 1)
    att = proj[:, :, :n_label]                               # (TN,V,L)
    s = proj[:, :, n_label:]                                 # (TN,V,1)

    # NOTE: no max-subtraction before exp -- matches the PyTorch module exactly.
    w = jnp.exp(att) * m_ref[...]                            # (TN,V,L)
    denom = jnp.sum(w + 0.001, axis=1, keepdims=True)        # (TN,1,L)
    w = w * pl.reciprocal(denom, approx=True)                # EUP, not VALU divide

    # logit_l = sum_v w_{l,v} * (h_v . out_w) + out_b   (out_w folded through sum)
    logits = jnp.sum(w * s, axis=1, keepdims=True)           # (TN,1,L)
    y_ref[...] = jax.nn.sigmoid(logits + ob_ref[0])


def _conv_pass(x, w_taps, scale, shift, case_tile):
    """One conv stage over a case-tiled grid; returns raw output + per-tile stats."""
    n, v, cin = x.shape
    cout = w_taps.shape[-1]
    ntiles = n // case_tile
    apply_bn_relu = scale is not None

    operands = [x]
    in_specs = [pl.BlockSpec((case_tile, v, cin), lambda i: (i, 0, 0))]
    if apply_bn_relu:
        operands += [scale, shift]
        in_specs += [pl.BlockSpec((1, 1, cin), lambda i: (0, 0, 0)),
                     pl.BlockSpec((1, 1, cin), lambda i: (0, 0, 0))]
    operands += [w_taps]
    in_specs += [pl.BlockSpec((3, cin, cout), lambda i: (0, 0, 0))]

    kernel = functools.partial(_conv_stats_kernel, apply_bn_relu=apply_bn_relu)
    raw, stats = pl.pallas_call(
        kernel,
        out_shape=(jax.ShapeDtypeStruct((n, v, cout), jnp.float32),
                   jax.ShapeDtypeStruct((ntiles, 2, cout), jnp.float32)),
        grid=(ntiles,),
        in_specs=in_specs,
        out_specs=(pl.BlockSpec((case_tile, v, cout), lambda i: (i, 0, 0)),
                   pl.BlockSpec((1, 2, cout), lambda i: (i, 0, 0))),
        compiler_params=_compiler_params(),
    )(*operands)
    return raw, stats


def _bn_affine(stats, count, gamma, beta):
    """Fold training-mode BatchNorm (full-batch stats, biased variance) and
    gamma/beta into a per-channel scale/shift, from per-tile (sum, sumsq)."""
    total = jnp.sum(stats, axis=0)                  # (2, C)
    mean = total[0] / count
    var = total[1] / count - mean * mean            # biased variance (training mode)
    scale = gamma * jax.lax.rsqrt(var + _BN_EPS)
    shift = beta - mean * scale
    c = scale.shape[0]
    return scale.reshape(1, 1, c), shift.reshape(1, 1, c)


@functools.partial(jax.jit, static_argnames=("case_tile",))
def call_predictor_pallas(x, m, w1, bn1_g, bn1_b, w2, bn2_g, bn2_b,
                          lweight, out_w, out_b, *, case_tile=None):
    """x: (N, V, Cin) float32, m: (N, V) float32.

    w1: (C1, Cin, 3), w2: (C2, C1, 3)  -- PyTorch Conv1d weight layout.
    lweight: (L, C2, 1), out_w: (1, C2), out_b: (1,).
    Returns hat_y: (N, L).
    """
    n, v, cin = x.shape
    c2 = w2.shape[0]
    n_label = lweight.shape[0]

    if case_tile is None:
        case_tile = min(n, 8)
        while n % case_tile:
            case_tile -= 1
    assert n % case_tile == 0, "case_tile must divide n_case"
    ntiles = n // case_tile

    x = x.astype(jnp.float32)
    m3 = m.astype(jnp.float32).reshape(n, v, 1)

    # weight glue outside the kernels: tap-major conv weights, fused
    # [attention | output-projection] matrix, SMEM scalar bias.
    w1_taps = jnp.transpose(w1.astype(jnp.float32), (2, 1, 0))         # (3, Cin, C1)
    w2_taps = jnp.transpose(w2.astype(jnp.float32), (2, 1, 0))         # (3, C1, C2)
    lwow = jnp.concatenate(
        [jnp.transpose(lweight[:, :, 0].astype(jnp.float32), (1, 0)),  # (C2, L)
         jnp.transpose(out_w.astype(jnp.float32), (1, 0))], axis=1)    # (C2, L+1)
    ob = out_b.astype(jnp.float32).reshape(1)

    # stage 1: conv1 + per-tile BN stats
    raw1, stats1 = _conv_pass(x, w1_taps, None, None, case_tile)
    scale1, shift1 = _bn_affine(stats1, n * v,
                                bn1_g.astype(jnp.float32), bn1_b.astype(jnp.float32))

    # stage 2: BN1 + ReLU + conv2 + per-tile BN stats
    raw2, stats2 = _conv_pass(raw1, w2_taps, scale1, shift1, case_tile)
    scale2, shift2 = _bn_affine(stats2, n * v,
                                bn2_g.astype(jnp.float32), bn2_b.astype(jnp.float32))

    # stage 3: BN2 + ReLU + attention + sigmoid head
    y = pl.pallas_call(
        _attention_kernel,
        out_shape=jax.ShapeDtypeStruct((n, 1, n_label), jnp.float32),
        grid=(ntiles,),
        in_specs=[
            pl.BlockSpec((case_tile, v, c2), lambda i: (i, 0, 0)),     # raw2 tile
            pl.BlockSpec((1, 1, c2), lambda i: (0, 0, 0)),             # scale2
            pl.BlockSpec((1, 1, c2), lambda i: (0, 0, 0)),             # shift2
            pl.BlockSpec((case_tile, v, 1), lambda i: (i, 0, 0)),      # mask tile
            pl.BlockSpec((c2, n_label + 1), lambda i: (0, 0)),         # [lw | ow]
            pl.BlockSpec(memory_space=pltpu.MemorySpace.SMEM),         # out_b scalar
        ],
        out_specs=pl.BlockSpec((case_tile, 1, n_label), lambda i: (i, 0, 0)),
        compiler_params=_compiler_params(),
    )(raw2, scale2, shift2, m3, lwow, ob)
    return y.reshape(n, n_label)


def _reference(x, m, w1, bn1_g, bn1_b, w2, bn2_g, bn2_b, lweight, out_w, out_b):
    """Pure-JAX reference mirroring the PyTorch forward (training-mode BN)."""
    def conv_bn_relu(x, w, g, b):
        z = jnp.zeros_like(x[:, :1, :])
        xc = jnp.concatenate(
            [jnp.concatenate([z, x[:, :-1, :]], 1), x,
             jnp.concatenate([x[:, 1:, :], z], 1)], -1)
        wm = jnp.transpose(w, (2, 1, 0)).reshape(-1, w.shape[0])
        out = jnp.einsum('nvk,ko->nvo', xc, wm)
        mean = out.mean(axis=(0, 1), keepdims=True)
        var = jnp.square(out - mean).mean(axis=(0, 1), keepdims=True)
        out = (out - mean) / jnp.sqrt(var + _BN_EPS) * g + b
        return jnp.maximum(out, 0.0)

    h = conv_bn_relu(x, w1, bn1_g, bn1_b)
    h = conv_bn_relu(h, w2, bn2_g, bn2_b)
    n, v, c = h.shape
    att = (h.reshape(n * v, c) @ lweight[:, :, 0].T).reshape(n, v, -1)
    ys = []
    for l in range(att.shape[-1]):
        w = jnp.exp(att[:, :, l]) * m
        w = w / jnp.sum(w + 0.001, axis=1, keepdims=True)
        ens = jnp.sum(w[:, :, None] * h, axis=1)
        ys.append(jax.nn.sigmoid(ens @ out_w.T + out_b))
    return jnp.concatenate(ys, axis=1)


if __name__ == "__main__":
    # small shapes consistent with the module
    n_case, n_visit, n_feat = 2, 16, 1          # input_channel = 1
    conv_channel = [8, 8]
    label_size = 2

    key = jax.random.PRNGKey(0)
    keys = jax.random.split(key, 8)

    x = jax.random.normal(keys[0], (n_case, n_visit, n_feat), jnp.float32)
    m = (jax.random.uniform(keys[1], (n_case, n_visit)) > 0.3).astype(jnp.float32)

    c1, c2 = conv_channel
    w1 = 0.5 * jax.random.normal(keys[2], (c1, n_feat, 3), jnp.float32)
    w2 = 0.2 * jax.random.normal(keys[3], (c2, c1, 3), jnp.float32)
    bn1_g, bn1_b = jnp.ones((c1,), jnp.float32), jnp.zeros((c1,), jnp.float32)
    bn2_g, bn2_b = jnp.ones((c2,), jnp.float32), jnp.zeros((c2,), jnp.float32)
    # module init for lweight is torch.zeros; use small values to exercise the path
    lweight = 0.1 * jax.random.normal(keys[4], (label_size, c2, 1), jnp.float32)
    out_w = 0.3 * jax.random.normal(keys[5], (1, c2), jnp.float32)
    out_b = 0.1 * jax.random.normal(keys[6], (1,), jnp.float32)

    params = (w1, bn1_g, bn1_b, w2, bn2_g, bn2_b, lweight, out_w, out_b)

    # case_tile=1 -> grid=(2,), exercising the case-tiled "parallel" grid and the
    # cross-tile BatchNorm-statistic aggregation path.
    hat_y = call_predictor_pallas(x, m, *params, case_tile=1)
    hat_y = jax.block_until_ready(hat_y)

    ref = _reference(x, m, *params)
    # tolerance allows for pl.reciprocal(approx=True) in the attention normalization
    np.testing.assert_allclose(np.asarray(hat_y), np.asarray(ref),
                               rtol=2e-3, atol=1e-3)
    print("KERNEL_OK")
</pallas_src>

<mosaic_0001>
module attributes {stable_mosaic.version = 11 : i64} {
  func.func @_conv_stats_kernel(%arg0: i32, %arg1: memref<1x16x1xf32, #tpu.memory_space<vmem>>, %arg2: memref<3x1x8xf32, #tpu.memory_space<vmem>>, %arg3: memref<1x16x8xf32, #tpu.memory_space<vmem>>, %arg4: memref<1x2x8xf32, #tpu.memory_space<vmem>>) attributes {dimension_semantics = [#tpu.dimension_semantics<parallel>], iteration_bounds = array<i64: 2>, scalar_prefetch = 0 : i64, scratch_operands = 0 : i64, tpu.core_type = #tpu.core_type<tc>, window_params = [{transform_indices = @transform_0, window_bounds = array<i64: 1, 16, 1>}, {pipeline_mode = #tpu.pipeline_mode<synchronous>, transform_indices = @transform_1, window_bounds = array<i64: 3, 1, 8>}, {transform_indices = @transform_2, window_bounds = array<i64: 1, 16, 8>}, {transform_indices = @transform_3, window_bounds = array<i64: 1, 2, 8>}]} {
    %c0 = arith.constant 0 : index
    %c0_0 = arith.constant 0 : index
    %c0_1 = arith.constant 0 : index
    %0 = vector.load %arg1[%c0, %c0_0, %c0_1] : memref<1x16x1xf32, #tpu.memory_space<vmem>>, vector<1x16x1xf32>
    %cst = arith.constant 0.000000e+00 : f32
    %1 = vector.broadcast %cst : f32 to vector<1x1x1xf32>
    %2 = vector.extract_strided_slice %0 {offsets = [0, 0, 0], sizes = [1, 15, 1], strides = [1, 1, 1]} : vector<1x16x1xf32> to vector<1x15x1xf32>
    %3 = tpu.concatenate %1, %2 in 1 : vector<1x1x1xf32>, vector<1x15x1xf32> -> vector<1x16x1xf32>
    %4 = vector.extract_strided_slice %0 {offsets = [0, 1, 0], sizes = [1, 15, 1], strides = [1, 1, 1]} : vector<1x16x1xf32> to vector<1x15x1xf32>
    %5 = tpu.concatenate %4, %1 in 1 : vector<1x15x1xf32>, vector<1x1x1xf32> -> vector<1x16x1xf32>
    %6 = vector.shape_cast %3 : vector<1x16x1xf32> to vector<16x1xf32>
    %c0_2 = arith.constant 0 : index
    %c0_3 = arith.constant 0 : index
    %c0_4 = arith.constant 0 : index
    %7 = vector.load %arg2[%c0_2, %c0_3, %c0_4] : memref<3x1x8xf32, #tpu.memory_space<vmem>>, vector<1x1x8xf32>
    %8 = vector.shape_cast %7 : vector<1x1x8xf32> to vector<1x8xf32>
    %9 = vector.broadcast %6 : vector<16x1xf32> to vector<16x8xf32>
    %10 = vector.broadcast %8 : vector<1x8xf32> to vector<16x8xf32>
    %11 = arith.mulf %9, %10 : vector<16x8xf32>
    %12 = vector.shape_cast %0 : vector<1x16x1xf32> to vector<16x1xf32>
    %c1 = arith.constant 1 : index
    %c0_5 = arith.constant 0 : index
    %c0_6 = arith.constant 0 : index
    %13 = vector.load %arg2[%c1, %c0_5, %c0_6] : memref<3x1x8xf32, #tpu.memory_space<vmem>>, vector<1x1x8xf32>
    %14 = vector.shape_cast %13 : vector<1x1x8xf32> to vector<1x8xf32>
    %15 = vector.broadcast %12 : vector<16x1xf32> to vector<16x8xf32>
    %16 = vector.broadcast %14 : vector<1x8xf32> to vector<16x8xf32>
    %17 = arith.mulf %15, %16 : vector<16x8xf32>
    %18 = arith.addf %11, %17 : vector<16x8xf32>
    %19 = vector.shape_cast %5 : vector<1x16x1xf32> to vector<16x1xf32>
    %c2 = arith.constant 2 : index
    %c0_7 = arith.constant 0 : index
    %c0_8 = arith.constant 0 : index
    %20 = vector.load %arg2[%c2, %c0_7, %c0_8] : memref<3x1x8xf32, #tpu.memory_space<vmem>>, vector<1x1x8xf32>
    %21 = vector.shape_cast %20 : vector<1x1x8xf32> to vector<1x8xf32>
    %22 = vector.broadcast %19 : vector<16x1xf32> to vector<16x8xf32>
    %23 = vector.broadcast %21 : vector<1x8xf32> to vector<16x8xf32>
    %24 = arith.mulf %22, %23 : vector<16x8xf32>
    %25 = arith.addf %18, %24 : vector<16x8xf32>
    %26 = vector.shape_cast %25 : vector<16x8xf32> to vector<1x16x8xf32>
    %c0_9 = arith.constant 0 : index
    %c0_10 = arith.constant 0 : index
    %c0_11 = arith.constant 0 : index
    %27 = vector.load %arg3[%c0_9, %c0_10, %c0_11] : memref<1x16x8xf32, #tpu.memory_space<vmem>>, vector<1x16x8xf32>
    tpu.vector_store %arg3[%c0_9, %c0_10, %c0_11], %26 {strides = array<i32>} : memref<1x16x8xf32, #tpu.memory_space<vmem>>, vector<1x16x8xf32>,
    %cst_12 = arith.constant dense<0.000000e+00> : vector<8xf32>
    %28 = vector.multi_reduction <add>, %25, %cst_12 [0] : vector<16x8xf32> to vector<8xf32>
    %29 = vector.shape_cast %28 : vector<8xf32> to vector<1x8xf32>
    %30 = arith.mulf %25, %25 : vector<16x8xf32>
    %cst_13 = arith.constant dense<0.000000e+00> : vector<8xf32>
    %31 = vector.multi_reduction <add>, %30, %cst_13 [0] : vector<16x8xf32> to vector<8xf32>
    %32 = vector.shape_cast %31 : vector<8xf32> to vector<1x8xf32>
    %33 = tpu.concatenate %29, %32 in 0 : vector<1x8xf32>, vector<1x8xf32> -> vector<2x8xf32>
    %34 = vector.shape_cast %33 : vector<2x8xf32> to vector<1x2x8xf32>
    %c0_14 = arith.constant 0 : index
    %c0_15 = arith.constant 0 : index
    %c0_16 = arith.constant 0 : index
    %35 = vector.load %arg4[%c0_14, %c0_15, %c0_16] : memref<1x2x8xf32, #tpu.memory_space<vmem>>, vector<1x2x8xf32>
    tpu.vector_store %arg4[%c0_14, %c0_15, %c0_16], %34 {strides = array<i32>} : memref<1x2x8xf32, #tpu.memory_space<vmem>>, vector<1x2x8xf32>,
    return
  }
  func.func @transform_0(%arg0: i32) -> (i32, i32, i32) {
    %c0_i32 = arith.constant 0 : i32
    %c0_i32_0 = arith.constant 0 : i32
    %c0_i32_1 = arith.constant 0 : i32
    return %arg0, %c0_i32, %c0_i32_0 : i32, i32, i32
  }
  func.func @transform_1(%arg0: i32) -> (i32, i32, i32) {
    %c0_i32 = arith.constant 0 : i32
    %c0_i32_0 = arith.constant 0 : i32
    %c0_i32_1 = arith.constant 0 : i32
    %c0_i32_2 = arith.constant 0 : i32
    return %c0_i32, %c0_i32_0, %c0_i32_1 : i32, i32, i32
  }
  func.func @transform_2(%arg0: i32) -> (i32, i32, i32) {
    %c0_i32 = arith.constant 0 : i32
    %c0_i32_0 = arith.constant 0 : i32
    %c0_i32_1 = arith.constant 0 : i32
    return %arg0, %c0_i32, %c0_i32_0 : i32, i32, i32
  }
  func.func @transform_3(%arg0: i32) -> (i32, i32, i32) {
    %c0_i32 = arith.constant 0 : i32
    %c0_i32_0 = arith.constant 0 : i32
    %c0_i32_1 = arith.constant 0 : i32
    return %arg0, %c0_i32, %c0_i32_0 : i32, i32, i32
  }
}

module attributes {stable_mosaic.version = 11 : i64} {
  func.func @_conv_stats_kernel(%arg0: i32, %arg1: memref<1x16x8xf32, #tpu.memory_space<vmem>>, %arg2: memref<1x1x8xf32, #tpu.memory_space<vmem>>, %arg3: memref<1x1x8xf32, #tpu.memory_space<vmem>>, %arg4: memref<3x8x8xf32, #tpu.memory_space<vmem>>, %arg5: memref<1x16x8xf32, #tpu.memory_space<vmem>>, %arg6: memref<1x2x8xf32, #tpu.memory_space<vmem>>) attributes {dimension_semantics = [#tpu.dimension_semantics<parallel>], iteration_bounds = array<i64: 2>, scalar_prefetch = 0 : i64, scratch_operands = 0 : i64, tpu.core_type = #tpu.core_type<tc>, window_params = [{transform_indices = @transform_0, window_bounds = array<i64: 1, 16, 8>}, {pipeline_mode = #tpu.pipeline_mode<synchronous>, transform_indices = @transform_1, window_bounds = array<i64: 1, 1, 8>}, {pipeline_mode = #tpu.pipeline_mode<synchronous>, transform_indices = @transform_2, window_bounds = array<i64: 1, 1, 8>}, {pipeline_mode = #tpu.pipeline_mode<synchronous>, transform_indices = @transform_3, window_bounds = array<i64: 3, 8, 8>}, {transform_indices = @transform_4, window_bounds = array<i64: 1, 16, 8>}, {transform_indices = @transform_5, window_bounds = array<i64: 1, 2, 8>}]} {
    %c0 = arith.constant 0 : index
    %c0_0 = arith.constant 0 : index
    %c0_1 = arith.constant 0 : index
    %0 = vector.load %arg1[%c0, %c0_0, %c0_1] : memref<1x16x8xf32, #tpu.memory_space<vmem>>, vector<1x16x8xf32>
    %c0_2 = arith.constant 0 : index
    %c0_3 = arith.constant 0 : index
    %c0_4 = arith.constant 0 : index
    %1 = vector.load %arg2[%c0_2, %c0_3, %c0_4] : memref<1x1x8xf32, #tpu.memory_space<vmem>>, vector<1x1x8xf32>
    %2 = vector.broadcast %1 : vector<1x1x8xf32> to vector<1x16x8xf32>
    %3 = arith.mulf %0, %2 : vector<1x16x8xf32>
    %c0_5 = arith.constant 0 : index
    %c0_6 = arith.constant 0 : index
    %c0_7 = arith.constant 0 : index
    %4 = vector.load %arg3[%c0_5, %c0_6, %c0_7] : memref<1x1x8xf32, #tpu.memory_space<vmem>>, vector<1x1x8xf32>
    %5 = vector.broadcast %4 : vector<1x1x8xf32> to vector<1x16x8xf32>
    %6 = arith.addf %3, %5 : vector<1x16x8xf32>
    %cst = arith.constant 0.000000e+00 : f32
    %7 = vector.broadcast %cst : f32 to vector<1x16x8xf32>
    %8 = arith.maximumf %6, %7 : vector<1x16x8xf32>
    %cst_8 = arith.constant 0.000000e+00 : f32
    %9 = vector.broadcast %cst_8 : f32 to vector<1x1x8xf32>
    %10 = vector.extract_strided_slice %8 {offsets = [0, 0, 0], sizes = [1, 15, 8], strides = [1, 1, 1]} : vector<1x16x8xf32> to vector<1x15x8xf32>
    %11 = tpu.concatenate %9, %10 in 1 : vector<1x1x8xf32>, vector<1x15x8xf32> -> vector<1x16x8xf32>
    %12 = vector.extract_strided_slice %8 {offsets = [0, 1, 0], sizes = [1, 15, 8], strides = [1, 1, 1]} : vector<1x16x8xf32> to vector<1x15x8xf32>
    %13 = tpu.concatenate %12, %9 in 1 : vector<1x15x8xf32>, vector<1x1x8xf32> -> vector<1x16x8xf32>
    %14 = vector.shape_cast %11 : vector<1x16x8xf32> to vector<16x8xf32>
    %c0_9 = arith.constant 0 : index
    %c0_10 = arith.constant 0 : index
    %c0_11 = arith.constant 0 : index
    %15 = vector.load %arg4[%c0_9, %c0_10, %c0_11] : memref<3x8x8xf32, #tpu.memory_space<vmem>>, vector<1x8x8xf32>
    %16 = vector.shape_cast %15 : vector<1x8x8xf32> to vector<8x8xf32>
    %cst_12 = arith.constant dense<0.000000e+00> : vector<16x8xf32>
    %17 = tpu.matmul %14, %16, %cst_12 {dimension_numbers = #tpu.dot_dimension_numbers<[1], [0], [0], [1], [0, 0, 1, 1], [], []>} : vector<16x8xf32>, vector<8x8xf32>, vector<16x8xf32> -> vector<16x8xf32>
    %18 = vector.shape_cast %8 : vector<1x16x8xf32> to vector<16x8xf32>
    %c1 = arith.constant 1 : index
    %c0_13 = arith.constant 0 : index
    %c0_14 = arith.constant 0 : index
    %19 = vector.load %arg4[%c1, %c0_13, %c0_14] : memref<3x8x8xf32, #tpu.memory_space<vmem>>, vector<1x8x8xf32>
    %20 = vector.shape_cast %19 : vector<1x8x8xf32> to vector<8x8xf32>
    %cst_15 = arith.constant dense<0.000000e+00> : vector<16x8xf32>
    %21 = tpu.matmul %18, %20, %cst_15 {dimension_numbers = #tpu.dot_dimension_numbers<[1], [0], [0], [1], [0, 0, 1, 1], [], []>} : vector<16x8xf32>, vector<8x8xf32>, vector<16x8xf32> -> vector<16x8xf32>
    %22 = arith.addf %17, %21 : vector<16x8xf32>
    %23 = vector.shape_cast %13 : vector<1x16x8xf32> to vector<16x8xf32>
    %c2 = arith.constant 2 : index
    %c0_16 = arith.constant 0 : index
    %c0_17 = arith.constant 0 : index
    %24 = vector.load %arg4[%c2, %c0_16, %c0_17] : memref<3x8x8xf32, #tpu.memory_space<vmem>>, vector<1x8x8xf32>
    %25 = vector.shape_cast %24 : vector<1x8x8xf32> to vector<8x8xf32>
    %cst_18 = arith.constant dense<0.000000e+00> : vector<16x8xf32>
    %26 = tpu.matmul %23, %25, %cst_18 {dimension_numbers = #tpu.dot_dimension_numbers<[1], [0], [0], [1], [0, 0, 1, 1], [], []>} : vector<16x8xf32>, vector<8x8xf32>, vector<16x8xf32> -> vector<16x8xf32>
    %27 = arith.addf %22, %26 : vector<16x8xf32>
    %28 = vector.shape_cast %27 : vector<16x8xf32> to vector<1x16x8xf32>
    %c0_19 = arith.constant 0 : index
    %c0_20 = arith.constant 0 : index
    %c0_21 = arith.constant 0 : index
    %29 = vector.load %arg5[%c0_19, %c0_20, %c0_21] : memref<1x16x8xf32, #tpu.memory_space<vmem>>, vector<1x16x8xf32>
    tpu.vector_store %arg5[%c0_19, %c0_20, %c0_21], %28 {strides = array<i32>} : memref<1x16x8xf32, #tpu.memory_space<vmem>>, vector<1x16x8xf32>,
    %cst_22 = arith.constant dense<0.000000e+00> : vector<8xf32>
    %30 = vector.multi_reduction <add>, %27, %cst_22 [0] : vector<16x8xf32> to vector<8xf32>
    %31 = vector.shape_cast %30 : vector<8xf32> to vector<1x8xf32>
    %32 = arith.mulf %27, %27 : vector<16x8xf32>
    %cst_23 = arith.constant dense<0.000000e+00> : vector<8xf32>
    %33 = vector.multi_reduction <add>, %32, %cst_23 [0] : vector<16x8xf32> to vector<8xf32>
    %34 = vector.shape_cast %33 : vector<8xf32> to vector<1x8xf32>
    %35 = tpu.concatenate %31, %34 in 0 : vector<1x8xf32>, vector<1x8xf32> -> vector<2x8xf32>
    %36 = vector.shape_cast %35 : vector<2x8xf32> to vector<1x2x8xf32>
    %c0_24 = arith.constant 0 : index
    %c0_25 = arith.constant 0 : index
    %c0_26 = arith.constant 0 : index
    %37 = vector.load %arg6[%c0_24, %c0_25, %c0_26] : memref<1x2x8xf32, #tpu.memory_space<vmem>>, vector<1x2x8xf32>
    tpu.vector_store %arg6[%c0_24, %c0_25, %c0_26], %36 {strides = array<i32>} : memref<1x2x8xf32, #tpu.memory_space<vmem>>, vector<1x2x8xf32>,
    return
  }
  func.func @transform_0(%arg0: i32) -> (i32, i32, i32) {
    %c0_i32 = arith.constant 0 : i32
    %c0_i32_0 = arith.constant 0 : i32
    %c0_i32_1 = arith.constant 0 : i32
    return %arg0, %c0_i32, %c0_i32_0 : i32, i32, i32
  }
  func.func @transform_1(%arg0: i32) -> (i32, i32, i32) {
    %c0_i32 = arith.constant 0 : i32
    %c0_i32_0 = arith.constant 0 : i32
    %c0_i32_1 = arith.constant 0 : i32
    %c0_i32_2 = arith.constant 0 : i32
    return %c0_i32, %c0_i32_0, %c0_i32_1 : i32, i32, i32
  }
  func.func @transform_2(%arg0: i32) -> (i32, i32, i32) {
    %c0_i32 = arith.constant 0 : i32
    %c0_i32_0 = arith.constant 0 : i32
    %c0_i32_1 = arith.constant 0 : i32
    %c0_i32_2 = arith.constant 0 : i32
    return %c0_i32, %c0_i32_0, %c0_i32_1 : i32, i32, i32
  }
  func.func @transform_3(%arg0: i32) -> (i32, i32, i32) {
    %c0_i32 = arith.constant 0 : i32
    %c0_i32_0 = arith.constant 0 : i32
    %c0_i32_1 = arith.constant 0 : i32
    %c0_i32_2 = arith.constant 0 : i32
    return %c0_i32, %c0_i32_0, %c0_i32_1 : i32, i32, i32
  }
  func.func @transform_4(%arg0: i32) -> (i32, i32, i32) {
    %c0_i32 = arith.constant 0 : i32
    %c0_i32_0 = arith.constant 0 : i32
    %c0_i32_1 = arith.constant 0 : i32
    return %arg0, %c0_i32, %c0_i32_0 : i32, i32, i32
  }
  func.func @transform_5(%arg0: i32) -> (i32, i32, i32) {
    %c0_i32 = arith.constant 0 : i32
    %c0_i32_0 = arith.constant 0 : i32
    %c0_i32_1 = arith.constant 0 : i32
    return %arg0, %c0_i32, %c0_i32_0 : i32, i32, i32
  }
}

module attributes {stable_mosaic.version = 11 : i64} {
  func.func @_attention_kernel(%arg0: i32, %arg1: memref<1x16x8xf32, #tpu.memory_space<vmem>>, %arg2: memref<1x1x8xf32, #tpu.memory_space<vmem>>, %arg3: memref<1x1x8xf32, #tpu.memory_space<vmem>>, %arg4: memref<1x16x1xf32, #tpu.memory_space<vmem>>, %arg5: memref<8x3xf32, #tpu.memory_space<vmem>>, %arg6: memref<1xf32, #tpu.memory_space<smem>>, %arg7: memref<1x1x2xf32, #tpu.memory_space<vmem>>) attributes {dimension_semantics = [#tpu.dimension_semantics<parallel>], iteration_bounds = array<i64: 2>, scalar_prefetch = 0 : i64, scratch_operands = 0 : i64, tpu.core_type = #tpu.core_type<tc>, window_params = [{transform_indices = @transform_0, window_bounds = array<i64: 1, 16, 8>}, {pipeline_mode = #tpu.pipeline_mode<synchronous>, transform_indices = @transform_1, window_bounds = array<i64: 1, 1, 8>}, {pipeline_mode = #tpu.pipeline_mode<synchronous>, transform_indices = @transform_2, window_bounds = array<i64: 1, 1, 8>}, {transform_indices = @transform_3, window_bounds = array<i64: 1, 16, 1>}, {pipeline_mode = #tpu.pipeline_mode<synchronous>, transform_indices = @transform_4, window_bounds = array<i64: 8, 3>}, {transform_indices = @transform_5, window_bounds = array<i64: 1>}, {transform_indices = @transform_6, window_bounds = array<i64: 1, 1, 2>}]} {
    %c0 = arith.constant 0 : index
    %c0_0 = arith.constant 0 : index
    %c0_1 = arith.constant 0 : index
    %0 = vector.load %arg1[%c0, %c0_0, %c0_1] : memref<1x16x8xf32, #tpu.memory_space<vmem>>, vector<1x16x8xf32>
    %c0_2 = arith.constant 0 : index
    %c0_3 = arith.constant 0 : index
    %c0_4 = arith.constant 0 : index
    %1 = vector.load %arg2[%c0_2, %c0_3, %c0_4] : memref<1x1x8xf32, #tpu.memory_space<vmem>>, vector<1x1x8xf32>
    %2 = vector.broadcast %1 : vector<1x1x8xf32> to vector<1x16x8xf32>
    %3 = arith.mulf %0, %2 : vector<1x16x8xf32>
    %c0_5 = arith.constant 0 : index
    %c0_6 = arith.constant 0 : index
    %c0_7 = arith.constant 0 : index
    %4 = vector.load %arg3[%c0_5, %c0_6, %c0_7] : memref<1x1x8xf32, #tpu.memory_space<vmem>>, vector<1x1x8xf32>
    %5 = vector.broadcast %4 : vector<1x1x8xf32> to vector<1x16x8xf32>
    %6 = arith.addf %3, %5 : vector<1x16x8xf32>
    %cst = arith.constant 0.000000e+00 : f32
    %7 = vector.broadcast %cst : f32 to vector<1x16x8xf32>
    %8 = arith.maximumf %6, %7 : vector<1x16x8xf32>
    %9 = vector.shape_cast %8 : vector<1x16x8xf32> to vector<16x8xf32>
    %c0_8 = arith.constant 0 : index
    %c0_9 = arith.constant 0 : index
    %10 = vector.load %arg5[%c0_8, %c0_9] : memref<8x3xf32, #tpu.memory_space<vmem>>, vector<8x3xf32>
    %cst_10 = arith.constant dense<0.000000e+00> : vector<16x3xf32>
    %11 = tpu.matmul %9, %10, %cst_10 {dimension_numbers = #tpu.dot_dimension_numbers<[1], [0], [0], [1], [0, 0, 1, 1], [], []>} : vector<16x8xf32>, vector<8x3xf32>, vector<16x3xf32> -> vector<16x3xf32>
    %12 = vector.shape_cast %11 : vector<16x3xf32> to vector<1x16x3xf32>
    %13 = vector.extract_strided_slice %12 {offsets = [0, 0, 0], sizes = [1, 16, 2], strides = [1, 1, 1]} : vector<1x16x3xf32> to vector<1x16x2xf32>
    %14 = vector.extract_strided_slice %12 {offsets = [0, 0, 2], sizes = [1, 16, 1], strides = [1, 1, 1]} : vector<1x16x3xf32> to vector<1x16x1xf32>
    %15 = math.exp %13 : vector<1x16x2xf32>
    %c0_11 = arith.constant 0 : index
    %c0_12 = arith.constant 0 : index
    %c0_13 = arith.constant 0 : index
    %16 = vector.load %arg4[%c0_11, %c0_12, %c0_13] : memref<1x16x1xf32, #tpu.memory_space<vmem>>, vector<1x16x1xf32>
    %17 = vector.broadcast %16 : vector<1x16x1xf32> to vector<1x16x2xf32>
    %18 = arith.mulf %15, %17 : vector<1x16x2xf32>
    %cst_14 = arith.constant 1.000000e-03 : f32
    %19 = vector.broadcast %cst_14 : f32 to vector<1x16x2xf32>
    %20 = arith.addf %18, %19 : vector<1x16x2xf32>
    %cst_15 = arith.constant dense<0.000000e+00> : vector<1x2xf32>
    %21 = vector.multi_reduction <add>, %20, %cst_15 [1] : vector<1x16x2xf32> to vector<1x2xf32>
    %22 = vector.shape_cast %21 : vector<1x2xf32> to vector<1x1x2xf32>
    %23 = tpu.reciprocal %22 {approx = true} : vector<1x1x2xf32> -> vector<1x1x2xf32>
    %24 = vector.broadcast %23 : vector<1x1x2xf32> to vector<1x16x2xf32>
    %25 = arith.mulf %18, %24 : vector<1x16x2xf32>
    %26 = vector.broadcast %14 : vector<1x16x1xf32> to vector<1x16x2xf32>
    %27 = arith.mulf %25, %26 : vector<1x16x2xf32>
    %cst_16 = arith.constant dense<0.000000e+00> : vector<1x2xf32>
    %28 = vector.multi_reduction <add>, %27, %cst_16 [1] : vector<1x16x2xf32> to vector<1x2xf32>
    %29 = vector.shape_cast %28 : vector<1x2xf32> to vector<1x1x2xf32>
    %c0_17 = arith.constant 0 : index
    %30 = memref.load %arg6[%c0_17] : memref<1xf32, #tpu.memory_space<smem>>
    %31 = vector.broadcast %30 : f32 to vector<1x1x2xf32>
    %32 = arith.addf %29, %31 : vector<1x1x2xf32>
    %33 = arith.negf %32 : vector<1x1x2xf32>
    %34 = math.exp %33 : vector<1x1x2xf32>
    %cst_18 = arith.constant 1.000000e+00 : f32
    %35 = vector.broadcast %cst_18 : f32 to vector<1x1x2xf32>
    %36 = arith.addf %35, %34 : vector<1x1x2xf32>
    %37 = arith.divf %35, %36 : vector<1x1x2xf32>
    %c0_19 = arith.constant 0 : index
    %c0_20 = arith.constant 0 : index
    %c0_21 = arith.constant 0 : index
    %38 = vector.load %arg7[%c0_19, %c0_20, %c0_21] : memref<1x1x2xf32, #tpu.memory_space<vmem>>, vector<1x1x2xf32>
    tpu.vector_store %arg7[%c0_19, %c0_20, %c0_21], %37 {strides = array<i32>} : memref<1x1x2xf32, #tpu.memory_space<vmem>>, vector<1x1x2xf32>,
    return
  }
  func.func @transform_0(%arg0: i32) -> (i32, i32, i32) {
    %c0_i32 = arith.constant 0 : i32
    %c0_i32_0 = arith.constant 0 : i32
    %c0_i32_1 = arith.constant 0 : i32
    return %arg0, %c0_i32, %c0_i32_0 : i32, i32, i32
  }
  func.func @transform_1(%arg0: i32) -> (i32, i32, i32) {
    %c0_i32 = arith.constant 0 : i32
    %c0_i32_0 = arith.constant 0 : i32
    %c0_i32_1 = arith.constant 0 : i32
    %c0_i32_2 = arith.constant 0 : i32
    return %c0_i32, %c0_i32_0, %c0_i32_1 : i32, i32, i32
  }
  func.func @transform_2(%arg0: i32) -> (i32, i32, i32) {
    %c0_i32 = arith.constant 0 : i32
    %c0_i32_0 = arith.constant 0 : i32
    %c0_i32_1 = arith.constant 0 : i32
    %c0_i32_2 = arith.constant 0 : i32
    return %c0_i32, %c0_i32_0, %c0_i32_1 : i32, i32, i32
  }
  func.func @transform_3(%arg0: i32) -> (i32, i32, i32) {
    %c0_i32 = arith.constant 0 : i32
    %c0_i32_0 = arith.constant 0 : i32
    %c0_i32_1 = arith.constant 0 : i32
    return %arg0, %c0_i32, %c0_i32_0 : i32, i32, i32
  }
  func.func @transform_4(%arg0: i32) -> (i32, i32) {
    %c0_i32 = arith.constant 0 : i32
    %c0_i32_0 = arith.constant 0 : i32
    %c0_i32_1 = arith.constant 0 : i32
    return %c0_i32, %c0_i32_0 : i32, i32
  }
  func.func @transform_5(%arg0: i32) -> i32 {
    %c0_i32 = arith.constant 0 : i32
    %c0_i32_0 = arith.constant 0 : i32
    return %c0_i32 : i32
  }
  func.func @transform_6(%arg0: i32) -> (i32, i32, i32) {
    %c0_i32 = arith.constant 0 : i32
    %c0_i32_0 = arith.constant 0 : i32
    %c0_i32_1 = arith.constant 0 : i32
    return %arg0, %c0_i32, %c0_i32_0 : i32, i32, i32
  }
}

</mosaic_0001>

<bundles_post_ra>
// kernel: call_predictor_pallas.3
= control target key start
LH: loop header
LB: loop body
LE: loop exit
PB: predicated region body
PF: predicated region fallthrough
CT: control target
= control target key end

     0   :  { %s428_s12 = smov 0   ;;  %s468_s0 = inlined_call_operand.vmem [shape: f32[2,16,1], index: 0, kind: input, shape index: {}]   ;;  %s469_s1 = inlined_call_operand.vmem [shape: f32[3,1,8], index: 1, kind: input, shape index: {}]   ;;  %s470_s2 = inlined_call_operand.vmem [shape: f32[2,16,8], index: 2, kind: output, shape index: {0}]   ;;  %s471_s3 = inlined_call_operand.vmem [shape: f32[2,2,8], index: 3, kind: output, shape index: {1}]  }
   0x1 LB: > { %s369_s13 = sadd.s32 4294967295, %s405_s12   ;;  %p373_p0 = scmp.ge.s32.totalorder %s405_s12, 1  ;;  %s405_s12 = sphi %s428_s12, %s14_s12  }
   0x2   : > { %p140_p1 = scmp.lt.s32.totalorder %s405_s12, 3 }
   0x4   : > { %p141_p2 = pnand %p373_p0, %p140_p1 }
   0x5   : > { %p168_p3 = scmp.lt.s32.totalorder (!%p141_p2), %s369_s13, 1  ;;  %v407_v0 = vmov (!%p141_p2), 0   ;;  %vm186_vm0 = vcmask (!%p141_p2), 1040384   ;;  %vm192_vm1 = vcmask (!%p141_p2), 1046528   ;;  %v381_v14 = vld [vmem:[%s469_s1 + $0x1] ss:$0 sm:$0xff] (!%p141_p2) }
   0x6   : > { %144 = sbr.rel (%p141_p2) target bundleno = 179 (0xb3), region = 28  ;;  %397 = vset.pattern.permute.xlu1 (!%p141_p2), %v407_v0  ;;  %398 = vset.pattern.permute.xlu0 (!%p141_p2), %v407_v0  ;;  %v379_v15 = vld [vmem:[%s469_s1] ss:$0 sm:$0xff] (!%p141_p2)  ;;  %v383_v16 = vld [vmem:[%s469_s1 + $0x2] ss:$0 sm:$0xff] (!%p141_p2)  ;;  %vm257_vm2 = vcmask (!%p141_p2), 64512  }
   0x7   : > { %vm281_vm3 = vcmask (!%p141_p2), 58368  }
   0xd   : > { %s473_s13 = smov (!%p168_p3, %s369_s13), 1 }
   0xe   : > { %s386_s14 = sshll.u32 %s473_s13, 4  ;;  %s378_s27 = sshll.u32 %s473_s13, 1 }
   0xf   : > { %s172_s17 = scalar_lea.vmem %s468_s0, %s386_s14  ;;  %s177_s26 = scalar_lea.vmem %s470_s2, %s386_s14 }
  0x10   : > { %v182_v1 = vld [vmem:[%s172_s17] sm:$0xff]  ;;  %v183_v2 = vld [vmem:[%s172_s17 + $0x8] sm:$0xff]  ;;  %s181_s30 = scalar_lea.vmem %s471_s3, %s378_s27 }
  0x11   : > { %219 = vperm.xlu1 %397, %v182_v1   ;;  %v187_v3 = vrot.slane %v182_v1, 7  ;;  %v188_v4 = vrot.slane %v183_v2, 7  ;;  %v194_v5 = vrot.slane %v183_v2, 1  ;;  %v193_v7 = vrot.slane %v182_v1, 1 }
  0x13   : > { %v191_v6 = vsel %vm186_vm0, 0.0, %v187_v3  ;;  %v189_v8 = vsel %vm186_vm0, %v187_v3, %v188_v4  ;;  %v197_v9 = vsel %vm192_vm1, %v194_v5, 0.0  ;;  %v195_v10 = vsel %vm192_vm1, %v193_v7, %v194_v5 }
  0x14   : > { %201 = vperm.xlu0 %398, %v191_v6  }
  0x15   : > { %223 = vperm.xlu1 %397, %v183_v2  }
  0x18   : > { %205 = vperm.xlu0 %398, %v189_v8  }
  0x19   : > { %244 = vperm.xlu1 %397, %v197_v9  }
  0x1c   : > { %239 = vperm.xlu0 %398, %v195_v10  }
  0x90   : > { %v220_v11 = vpop.permute.xlu1 %219 }
  0x91   : > { %v232_v18 = vmul.f32 %v381_v14, %v220_v11 }
  0x93   : > { %v202_v12 = vpop.permute.xlu0 %201 }
  0x94   : > { %v224_v13 = vpop.permute.xlu1 %223  ;;  %v214_v19 = vmul.f32 %v379_v15, %v202_v12 }
  0x95   : > { %v233_v20 = vmul.f32 %v381_v14, %v224_v13 }
  0x96   : > { %v234_v26 = vadd.f32 %v232_v18, %v214_v19 }
  0x97   : > { %v206_v17 = vpop.permute.xlu0 %205 }
  0x98   : > { %v215_v21 = vmul.f32 %v379_v15, %v206_v17  ;;  %v245_v22 = vpop.permute.xlu1 %244 }
  0x99   : > { %v254_v23 = vmul.f32 %v383_v16, %v245_v22 }
  0x9a   : > { %v235_v24 = vadd.f32 %v233_v20, %v215_v21 }
  0x9b   : > { %v240_v25 = vpop.permute.xlu0 %239 }
  0x9c   : > { %v256_v27 = vadd.f32 %v254_v23, %v235_v24  ;;  %v253_v28 = vmul.f32 %v383_v16, %v240_v25 }
  0x9e   : > { %259 = vst.msk [vmem:[%s177_s26 + $0x8] sm:$0xff] %vm257_vm2, %v256_v27  ;;  %v270_v29 = vmul.f32 %v256_v27, %v256_v27  ;;  %v255_v30 = vadd.f32 %v253_v28, %v234_v26  ;;  %v261_v31 = vsel %vm257_vm2, %v256_v27, 0.0 }
  0xa0   : > { %258 = vst.msk [vmem:[%s177_s26] sm:$0xff] %vm257_vm2, %v255_v30  ;;  %v260_v32 = vsel %vm257_vm2, %v255_v30, 0.0  ;;  %v269_v33 = vmul.f32 %v255_v30, %v255_v30  ;;  %v272_v35 = vsel %vm257_vm2, %v270_v29, 0.0 }
  0xa1   : > { %v262_v34 = vadd.f32 %v261_v31, %v260_v32 }
  0xa2   : > { %v271_v36 = vsel %vm257_vm2, %v269_v33, 0.0 }
  0xa3   : > { %v263_v37 = vrot.slane %v262_v34, 4  ;;  %v273_v38 = vadd.f32 %v272_v35, %v271_v36 }
  0xa5   : > { %v264_v39 = vadd.f32 %v263_v37, %v262_v34  ;;  %v274_v40 = vrot.slane %v273_v38, 4 }
  0xa7   : > { %v265_v41 = vrot.slane %v264_v39, 2  ;;  %v275_v42 = vadd.f32 %v274_v40, %v273_v38 }
  0xa9   : > { %v266_v43 = vadd.f32 %v265_v41, %v264_v39  ;;  %v276_v44 = vrot.slane %v275_v42, 2 }
  0xab   : > { %v267_v45 = vrot.slane %v266_v43, 1  ;;  %v277_v46 = vadd.f32 %v276_v44, %v275_v42 }
  0xad   : > { %v278_v47 = vrot.slane %v277_v46, 1  ;;  %v268_v48 = vadd.f32 %v267_v45, %v266_v43 }
  0xaf   : > { %v279_v49 = vadd.f32 %v278_v47, %v277_v46 }
  0xb1   : > { %v280_v50 = vsel %vm186_vm0, %v268_v48, %v279_v49 }
  0xb2   : > { %282 = vst.msk [vmem:[%s181_s30] sm:$0x3] %vm281_vm3, %v280_v50 }
  0xb3 PF: > { %s14_s12 = sadd.s32 1, %s405_s12  }
  0xb4   : > { %p11_p4 = scmp.ge.s32.totalorder %s14_s12, 4  }
  0xb6   :  { %13 = sbr.rel (!%p11_p4) target bundleno = 1 (0x1), region = 72 }

// kernel: call_predictor_pallas.4
= control target key start
LH: loop header
LB: loop body
LE: loop exit
PB: predicated region body
PF: predicated region fallthrough
CT: control target
= control target key end

     0   :  { %s728_s18 = smov 0   ;;  %s786_s0 = inlined_call_operand.vmem [shape: f32[2,16,8], index: 0, kind: input, shape index: {}]   ;;  %s787_s1 = inlined_call_operand.vmem [shape: f32[1,1,8], index: 1, kind: input, shape index: {}]   ;;  %s788_s2 = inlined_call_operand.vmem [shape: f32[1,1,8], index: 2, kind: input, shape index: {}]   ;;  %s789_s3 = inlined_call_operand.vmem [shape: f32[3,8,8], index: 3, kind: input, shape index: {}]   ;;  %s790_s4 = inlined_call_operand.vmem [shape: f32[2,16,8], index: 4, kind: output, shape index: {0}]   ;;  %s791_s5 = inlined_call_operand.vmem [shape: f32[2,2,8], index: 5, kind: output, shape index: {1}]  }
   0x1 LB: > { %s630_s19 = sadd.s32 4294967295, %s696_s18   ;;  %p634_p0 = scmp.ge.s32.totalorder %s696_s18, 1  ;;  %s696_s18 = sphi %s728_s18, %s16_s18  }
   0x2   : > { %p190_p1 = scmp.lt.s32.totalorder %s696_s18, 3 }
   0x4   : > { %p191_p2 = pnand %p634_p0, %p190_p1 }
   0x5   : > { %v272_v0 = vld [vmem:[%s789_s3] sm:$0xff] (!%p191_p2)  ;;  %p222_p3 = scmp.lt.s32.totalorder (!%p191_p2), %s630_s19, 1  ;;  %v647_v1 = vld [vmem:[%s789_s3 + $0x10] sm:$0xff] (!%p191_p2)  ;;  %v642_v2 = vld [vmem:[%s789_s3 + $0x8] sm:$0xff] (!%p191_p2)  ;;  %vm260_vm0 = vcmask (!%p191_p2), 1040384   ;;  %vm275_vm1 = vcmask (!%p191_p2), 64512  }
   0x6   : > { %194 = sbr.rel (%p191_p2) target bundleno = 269 (0x10d), region = 36  ;;  %668 = vmatprep.subr.mxu0 (!%p191_p2), %v272_v0  ;;  %663 = vmatprep.subr.mxu1 (!%p191_p2), %v642_v2  ;;  %v640_v3 = vld [vmem:[%s787_s1] ss:$0 sm:$0xff] (!%p191_p2)  ;;  %vm266_vm2 = vcmask (!%p191_p2), 1046528   ;;  %vm542_vm3 = vcmask (!%p191_p2), 58368  }
   0x7   : > { %669 = vmatpush3.msra.mxu0 (!%p191_p2), %v272_v0  ;;  %664 = vmatpush3.msra.mxu1 (!%p191_p2), %v642_v2  ;;  %v641_v6 = vld [vmem:[%s788_s2] ss:$0 sm:$0xff] (!%p191_p2) }
   0x8   : > { %673 = vmatprep.subr.mxu0 (!%p191_p2), %v647_v1 }
   0xd   : > { %s793_s19 = smov (!%p222_p3, %s630_s19), 1 }
   0xe   : > { %s652_s26 = sshll.u32 %s793_s19, 4  ;;  %s639_s12 = sshll.u32 %s793_s19, 1 }
   0xf   : > { %s226_s6 = scalar_lea.vmem %s786_s0, %s652_s26  ;;  %s231_s11 = scalar_lea.vmem %s790_s4, %s652_s26 }
  0x10   : > { %v236_v4 = vld [vmem:[%s226_s6] sm:$0xff]  ;;  %v237_v5 = vld [vmem:[%s226_s6 + $0x8] sm:$0xff]  ;;  %s235_s15 = scalar_lea.vmem %s791_s5, %s639_s12 }
  0x11   : > { %v245_v7 = vmul.f32 %v640_v3, %v236_v4  ;;  %v246_v8 = vmul.f32 %v640_v3, %v237_v5 }
  0x13   : > { %v254_v9 = vadd.f32 %v641_v6, %v245_v7  ;;  %v255_v10 = vadd.f32 %v641_v6, %v246_v8 }
  0x15   : > { %v256_v11 = vmax.f32 %v254_v9, 0.0  ;;  %v257_v12 = vmax.f32 %v255_v10, 0.0 }
  0x17   : > { %v261_v13 = vrot.slane %v256_v11, 7  ;;  %v262_v14 = vrot.slane %v257_v12, 7  ;;  %665 = vmatprep.mubr.msk.f32.mxu1 %vm275_vm1, %v256_v11  ;;  %v267_v15 = vrot.slane %v256_v11, 1  ;;  %v268_v16 = vrot.slane %v257_v12, 1 }
  0x18   : > { %666 = vmatmul.mubr.msk.f32.vlgmr.msra.gmra.mrb[0].mxu1 %vm275_vm1, %v257_v12 }
  0x19   : > { %v265_v17 = vsel %vm260_vm0, 0.0, %v261_v13  ;;  %v263_v18 = vsel %vm260_vm0, %v261_v13, %v262_v14  ;;  %v269_v19 = vsel %vm266_vm2, %v267_v15, %v268_v16  ;;  %v271_v20 = vsel %vm266_vm2, %v268_v16, 0.0 }
  0x1a   : > { %670 = vmatprep.mubr.msk.f32.mxu0 %vm275_vm1, %v265_v17 }
  0x1b   : > { %671 = vmatmul.mubr.msk.f32.vlgmr.msra.gmra.mrb[0].mxu0 %vm275_vm1, %v263_v18 }
  0x1c   : > { %674 = vmatpush3.msra.mxu0 %v647_v1  ;;  %675 = vmatprep.mubr.msk.f32.mxu0 %vm275_vm1, %v269_v19 }
  0x23   : > { %676 = vmatmul.mubr.msk.f32.vlgmr.msra.gmra.mrb[0].mxu0 %vm275_vm1, %v271_v20 }
  0xeb   : > { %v667_v21 = vpop.f32.mrb[0].mxu1 }
  0xec   : > { %v346_v22 = vpop.f32.mrb[1].mxu1 }
  0xf6   : > { %v677_v23 = vpop.f32.mrb[0].mxu0 }
  0xf7   : > { %v678_v24 = vadd.f32 %v677_v23, %v667_v21  ;;  %v508_v25 = vpop.f32.mrb[1].mxu0 }
  0xf8   : > { %v679_v26 = vadd.f32 %v508_v25, %v346_v22 }
  0xf9   : > { %520 = vst.msk [vmem:[%s231_s11 + $0x8] sm:$0xff] %vm275_vm1, %v678_v24  ;;  %v522_v27 = vsel %vm275_vm1, %v678_v24, 0.0  ;;  %v531_v28 = vmul.f32 %v678_v24, %v678_v24 }
  0xfa   : > { %519 = vst.msk [vmem:[%s231_s11] sm:$0xff] %vm275_vm1, %v679_v26  ;;  %v521_v29 = vsel %vm275_vm1, %v679_v26, 0.0  ;;  %v530_v30 = vmul.f32 %v679_v26, %v679_v26 }
  0xfb   : > { %v533_v31 = vsel %vm275_vm1, %v531_v28, 0.0  ;;  %v523_v32 = vadd.f32 %v522_v27, %v521_v29 }
  0xfc   : > { %v532_v33 = vsel %vm275_vm1, %v530_v30, 0.0 }
  0xfd   : > { %v524_v34 = vrot.slane %v523_v32, 4  ;;  %v534_v35 = vadd.f32 %v533_v31, %v532_v33 }
  0xff   : > { %v525_v36 = vadd.f32 %v524_v34, %v523_v32  ;;  %v535_v37 = vrot.slane %v534_v35, 4 }
 0x101   : > { %v526_v38 = vrot.slane %v525_v36, 2  ;;  %v536_v39 = vadd.f32 %v535_v37, %v534_v35 }
 0x103   : > { %v527_v40 = vadd.f32 %v526_v38, %v525_v36  ;;  %v537_v41 = vrot.slane %v536_v39, 2 }
 0x105   : > { %v528_v42 = vrot.slane %v527_v40, 1  ;;  %v538_v43 = vadd.f32 %v537_v41, %v536_v39 }
 0x107   : > { %v539_v44 = vrot.slane %v538_v43, 1  ;;  %v529_v45 = vadd.f32 %v528_v42, %v527_v40 }
 0x109   : > { %v540_v46 = vadd.f32 %v539_v44, %v538_v43 }
 0x10b   : > { %v541_v47 = vsel %vm260_vm0, %v529_v45, %v540_v46 }
 0x10c   : > { %543 = vst.msk [vmem:[%s235_s15] sm:$0x3] %vm542_vm3, %v541_v47 }
 0x10d PF: > { %s16_s18 = sadd.s32 1, %s696_s18  }
 0x10e   : > { %p13_p4 = scmp.ge.s32.totalorder %s16_s18, 4  }
 0x110   :  { %15 = sbr.rel (!%p13_p4) target bundleno = 1 (0x1), region = 80 }

// kernel: call_predictor_pallas.5
= control target key start
LH: loop header
LB: loop body
LE: loop exit
PB: predicated region body
PF: predicated region fallthrough
CT: control target
= control target key end

     0   :  { %s821_s0 = inlined_call_operand.vmem [shape: f32[2,16,8], index: 0, kind: input, shape index: {}]   ;;  %s822_s1 = inlined_call_operand.vmem [shape: f32[1,1,8], index: 1, kind: input, shape index: {}]   ;;  %s823_s2 = inlined_call_operand.vmem [shape: f32[1,1,8], index: 2, kind: input, shape index: {}]   ;;  %s824_s3 = inlined_call_operand.vmem [shape: f32[2,16,1], index: 3, kind: input, shape index: {}]   ;;  %s825_s4 = inlined_call_operand.vmem [shape: f32[8,3], index: 4, kind: input, shape index: {}]   ;;  %s826_s5 = inlined_call_operand.<no memory space> [shape: f32[1], index: 5, kind: input, shape index: {}]   ;;  %s827_s6 = inlined_call_operand.hbm [shape: f32[2,1,2], index: 6, kind: output, shape index: {}]  }
   0x1   :  { %11 = sst [smem:[#allocation2]] %s826_s5 }
   0x2   :  { %12 = vsyncpa [#allocation4], 0 }
   0x3   :  { %14 = vsyncpa [#allocation4 + $0x1], 0  ;;  %s705_s23 = smov 0   ;;  %s707_s24 = smov 0  }
   0x4   :  { %s709_s25 = smov 0   ;;  %s711_s26 = smov 0  }
   0x5 LB: > { %s726_s5 = sadd.s32 4294967295, %s662_s26   ;;  %s520_s27 = sadd.s32 4294967294, %s662_s26   ;;  %s662_s26 = sphi %s711_s26, %s833_s26   ;;  %s658_s25 = sphi %s709_s25, %s832_s25   ;;  %s654_s24 = sphi %s707_s24, %s831_s24   ;;  %s650_s23 = sphi %s705_s23, %s830_s23  }
   0x6   : > { %s730_s28 = sadd.s32 1, %s662_s26   ;;  %s163_s29 = sadd.s32 1, %s658_s25 }
   0x7   : > { %s160_s30 = ssub.s32 %s662_s26, %s730_s28  ;;  %p173_p0 = scmp.ne.s32.totalorder %s658_s25, %s654_s24 }
   0x8   : > { %p161_p1 = scmp.eq.s32.totalorder %s160_s30, 0  ;;  %p174_p2 = scmp.eq.s32.totalorder %s726_s5, 1 }
   0x9   : > { %p179_p3 = scmp.ne.s32.totalorder %s654_s24, %s650_s23  ;;  %p180_p4 = scmp.eq.s32.totalorder %s520_s27, 1 }
   0xa   : > { %s741_s7 = scalar_select %p161_p1, %s658_s25, %s163_s29  }
   0xb   : > { %p743_p5 = por %p174_p2, %p173_p0  ;;  %p747_p6 = por %p180_p4, %p179_p3 }
   0xc   : > { %p523_p7 = scmp.ge.s32.totalorder %s662_s26, 1  ;;  %p226_p8 = scmp.lt.s32.totalorder %s662_s26, 3 }
   0xe   : > { %p227_p9 = pnand %p523_p7, %p226_p8 }
   0xf   : > { %v292_v0 = vld [vmem:[%s825_s4] sm:$0xff] (!%p227_p9)  ;;  %p260_p10 = scmp.lt.s32.totalorder (!%p227_p9), %s726_s5, 1  ;;  %v664_v1 = vmov (!%p227_p9), 0   ;;  %vm293_vm0 = vcmask (!%p227_p9), 64512   ;;  %v665_v14 = vmov (!%p227_p9), 2   ;;  %vm395_vm1 = vcmask (!%p227_p9), 15360  }
  0x10   : > { %230 = sbr.rel (%p227_p9) target bundleno = 439 (0x1b7), region = 44  ;;  %541 = vmatprep.subr.mxu0 (!%p227_p9), %v292_v0  ;;  %587 = vset.pattern.permute.xlu0 (!%p227_p9), %v664_v1  ;;  %v528_v2 = vld [vmem:[%s822_s1] ss:$0 sm:$0xff] (!%p227_p9)  ;;  %s429_s29 = sld [smem:[#allocation2]] (!%p227_p9)  ;;  %vm438_vm2 = vcmask (!%p227_p9), 8192  }
  0x11   : > { %542 = vmatpush3.msra.mxu0 (!%p227_p9), %v292_v0  ;;  %v529_v3 = vld [vmem:[%s823_s2] ss:$0 sm:$0xff] (!%p227_p9)  ;;  %588 = vset.pattern.permute.xlu1 (!%p227_p9), %v665_v14  ;;  %s258_s30 = sand.u32 (!%p227_p9), 1, %s654_s24   ;;  %s533_s10 = sshll.u32 (!%p227_p9), %s726_s5, 4 }
  0x12   : > { %s259_s11 = scalar_lea.vmem (!%p227_p9), [#allocation3], %s258_s30  ;;  %s779_s15 = scalar_lea.hbm (!%p227_p9), %s827_s6, %s533_s10 }
  0x13   : > { %s441_s16 = scalar_lea.sflag (!%p227_p9), [#allocation4], %s258_s30 }
  0x16   : > { %v430_v51 = vstv (!%p227_p9), %s429_s29 }
  0x17   : > { %s261_s12 = scalar_select %p260_p10, %s726_s5, 1 }
  0x18   : > { %s666_s5 = smov [#allocation3]  }
  0x19   : > { %s536_s13 = sshll.u32 %s261_s12, 4  ;;  %s453_s12 = sshll.u32 %s259_s11, 4  ;;  %s781_s12 = int_to_ptr.vmem [resolvable:$true] %s453_s12 }
  0x1a   : > { %s264_s18 = scalar_lea.vmem %s821_s0, %s536_s13  ;;  %s269_s27 = scalar_lea.vmem %s824_s3, %s536_s13 }
  0x1b   : > { %v270_v4 = vld [vmem:[%s264_s18] sm:$0xff]  ;;  %v271_v5 = vld [vmem:[%s264_s18 + $0x8] sm:$0xff]  ;;  %s600_s17 = scalar_lea.vmem %s781_s12, 16  ;;  %s604_s18 = sshll.u32 %s666_s5, 4  ;;  %s605_s18 = int_to_ptr.vmem [resolvable:$false] %s604_s18 }
  0x1c   : > { %v379_v6 = vld [vmem:[%s269_s27] sm:$0xff]  ;;  %v279_v7 = vmul.f32 %v528_v2, %v270_v4  ;;  %v280_v8 = vmul.f32 %v528_v2, %v271_v5  ;;  %v380_v9 = vld [vmem:[%s269_s27 + $0x8] sm:$0xff]  ;;  %p601_p11 = scmp.ne.s32.totalorder %s781_s12, %s600_s17  ;;  %s606_s19 = scalar_lea.vmem %s605_s18, 32 }
  0x1d   : > { %383 = vperm.xlu0 %587, %v379_v6   ;;  %p607_p0 = scmp.lt.s32.totalorder %s781_s12, %s605_s18  ;;  %p608_p1 = scmp.lt.s32.totalorder %s606_s19, %s600_s17 }
  0x1e   : > { %v288_v10 = vadd.f32 %v529_v3, %v279_v7  ;;  %v289_v11 = vadd.f32 %v529_v3, %v280_v8  ;;  %p602_p12 = pnand %p601_p11, %p743_p5 }
  0x1f   : > { %p609_p2 = por %p608_p1, %p607_p0 }
  0x20   : > { %v290_v12 = vmax.f32 %v288_v10, 0.0  ;;  %v291_v13 = vmax.f32 %v289_v11, 0.0  ;;  %p603_p13 = pneg %p602_p12 }
  0x21   : > { %388 = vperm.xlu0 %587, %v380_v9  }
  0x22   : > { %543 = vmatprep.mubr.msk.f32.mxu0 %vm293_vm0, %v290_v12  ;;  %p610_p3 = pnand %p609_p2, %p603_p13 }
  0x23   : > { %544 = vmatmul.mubr.msk.f32.vlgmr.msra.gmra.mrb[0].mxu0 %vm293_vm0, %v291_v13 }
  0x25   : > { %589 = vset.pattern.permute.xlu0 %v665_v14 }
  0x9c   : > { %v384_v19 = vpop.permute.xlu0 %383 }
  0xa0   : > { %v389_v20 = vpop.permute.xlu0 %388 }
  0xf6   : > { %v545_v15 = vpop.f32.mrb[0].mxu0 }
  0xf7   : > { %v377_v16 = vmul.f32 1.442695, %v545_v15  ;;  %v366_v17 = vpop.f32.mrb[1].mxu0 }
  0xf8   : > { %v375_v18 = vmul.f32 1.442695, %v366_v17  ;;  %410 = vperm.xlu1 %588, %v366_v17  }
  0xf9   : > { %590 = vpow2.f32 %v377_v16 }
  0xfa   : > { %592 = vpow2.f32 %v375_v18 }
  0xfc   : > { %415 = vperm.xlu1 %588, %v545_v15  }
 0x103   : > { %v591_v21 = vpop.eup %590 }
 0x104   : > { %v593_v22 = vpop.eup %592  ;;  %v392_v23 = vmul.f32 %v591_v21, %v389_v20 }
 0x105   : > { %v391_v24 = vmul.f32 %v593_v22, %v384_v19 }
 0x106   : > { %v394_v25 = vadd.f32 0.001, %v392_v23 }
 0x107   : > { %v393_v26 = vadd.f32 0.001, %v391_v24 }
 0x108   : > { %v397_v27 = vsel %vm395_vm1, %v394_v25, 0.0 }
 0x109   : > { %v396_v28 = vsel %vm395_vm1, %v393_v26, 0.0 }
 0x10a   : > { %v398_v29 = vadd.f32 %v397_v27, %v396_v28 }
 0x10c   : > { %v399_v30 = vrot.slane %v398_v29, 4 }
 0x10e   : > { %v400_v31 = vadd.f32 %v399_v30, %v398_v29 }
 0x110   : > { %v401_v32 = vrot.slane %v400_v31, 2 }
 0x112   : > { %v402_v33 = vadd.f32 %v401_v32, %v400_v31 }
 0x114   : > { %v403_v34 = vrot.slane %v402_v33, 1 }
 0x116   : > { %v404_v35 = vadd.f32 %v403_v34, %v402_v33 }
 0x118   : > { %594 = vrcp.f32 %v404_v35 }
 0x122   : > { %v595_v36 = vpop.eup %594 }
 0x123   : > { %v406_v37 = vmul.f32 %v595_v36, %v391_v24  ;;  %v407_v38 = vmul.f32 %v595_v36, %v392_v23 }
 0x177   : > { %v411_v39 = vpop.permute.xlu1 %410 }
 0x178   : > { %v418_v40 = vmul.f32 %v411_v39, %v406_v37 }
 0x17a   : > { %v420_v43 = vsel %vm395_vm1, %v418_v40, 0.0 }
 0x17b   : > { %v416_v41 = vpop.permute.xlu1 %415 }
 0x17c   : > { %v419_v42 = vmul.f32 %v416_v41, %v407_v38 }
 0x17e   : > { %v421_v44 = vsel %vm395_vm1, %v419_v42, 0.0 }
 0x17f   : > { %v422_v45 = vadd.f32 %v421_v44, %v420_v43 }
 0x181   : > { %v423_v46 = vrot.slane %v422_v45, 4 }
 0x183   : > { %v424_v47 = vadd.f32 %v423_v46, %v422_v45 }
 0x185   : > { %v425_v48 = vrot.slane %v424_v47, 2 }
 0x187   : > { %v426_v49 = vadd.f32 %v425_v48, %v424_v47 }
 0x189   : > { %v427_v50 = vrot.slane %v426_v49, 1 }
 0x18b   : > { %v428_v52 = vadd.f32 %v427_v50, %v426_v49 }
 0x18d   : > { %v431_v53 = vadd.f32 %v430_v51, %v428_v52 }
 0x18f   : > { %v532_v54 = vmul.f32 -1.442695, %v431_v53 }
 0x191   : > { %596 = vpow2.f32 %v532_v54 }
 0x19b   : > { %v597_v55 = vpop.eup %596 }
 0x19c   : > { %v435_v56 = vadd.f32 1.0, %v597_v55 }
 0x19e   : > { %598 = vrcp.f32 %v435_v56 }
 0x1a8   : > { %v599_v57 = vpop.eup %598 }
 0x1a9   : > { %439 = vst.msk [vmem:[%s259_s11] sm:$0x1] %vm438_vm2, %v599_v57 }
 0x1aa   : > { %613 = shalt.err (!%p610_p3)
}
 0x1ab   : > { %s614_s20 = scalar_lea.hbm %s779_s15, 16  ;;  %s618_s27 = scalar_lea.hbm %s827_s6, 32 }
 0x1ac   : > { %p615_p4 = scmp.ne.s32.totalorder %s779_s15, %s614_s20  ;;  %p619_p9 = scmp.lt.u32.totalorder %s779_s15, %s827_s6 }
 0x1ad   : > { %p620_p10 = scmp.lt.u32.totalorder %s618_s27, %s614_s20  ;;  %p622_p12 = scmp.lt.u32.totalorder %s614_s20, %s779_s15 }
 0x1ae   : > { %p616_p7 = pnand %p615_p4, %p743_p5 }
 0x1af   : > { %p621_p11 = por %p620_p10, %p619_p9 }
 0x1b0   : > { %p617_p8 = pneg %p616_p7 }
 0x1b1   : > { %p623_p13 = por %p622_p12, %p621_p11 }
 0x1b3   : > { %p624_p0 = pnand %p623_p13, %p617_p8 }
 0x1b5   : > { %627 = shalt.err (!%p624_p0)
}
 0x1b6   : > { %546 = dma.vmem_to_hbm [thread:$0]  (%p743_p5), %s781_s12, 16, %s779_s15, %s441_s16  }
 0x1b7 PF: > { %p552_p1 = scmp.ge.s32.totalorder %s662_s26, 2  ;;  %s465_s10 = sand.u32 1, %s650_s23  }
 0x1b8   : > { %s466_s11 = scalar_lea.sflag [#allocation4], %s465_s10 }
 0x1b9   : > { %p549_p2 = pnand %p552_p1, %p747_p6 }
 0x1bb   : > { %645 = dma.done.wait (!%p549_p2), %s466_s11, 16  }
 0x1bc   : > { %647 = vsyncadd (!%p549_p2), %s466_s11, 4294967280  ;;  %p17_p3 = scmp.ge.s32.totalorder %s730_s28, 4   ;;  %s830_s23 = smov %s654_s24 }
 0x1bd   : > { %s831_s24 = smov %s658_s25  ;;  %s832_s25 = smov %s741_s7 }
 0x1be   : > { %s833_s26 = smov %s730_s28  ;;  %19 = sbr.rel (!%p17_p3) target bundleno = 5 (0x5), region = 82 }
 0x1c5   :  { %470 = vsyncpa [#allocation4], 1 }
 0x1c6   :  { %472 = vsyncpa [#allocation4 + $0x1], 1 }

</bundles_post_ra>
